<compile_context>
chip_gen: v7x
topology: tpu7x:2x2x1
jax: 0.10.0
libtpu: 0.0.40
codegen_flags: <defaults>
</compile_context>

<pallas_src>
import math

import jax
import jax.numpy as jnp
from jax.experimental import pallas as pl
from jax.experimental.pallas import tpu as pltpu

_LANE = 128
_SUBLANE = 8
# Per-block, per-buffer byte budget.  3 arrays x 2 buffers x 4 MiB = 24 MiB.
_MAX_BLOCK_BYTES = 4 << 20
# Scoped-VMEM limit requested from Mosaic (safe on v5e/v6e/v7x physical VMEM).
_VMEM_LIMIT_BYTES = 40 << 20
# Largest per-array size we allow as a single un-tiled block.
_FULL_BLOCK_BYTES = 4 << 20


def _mul_kernel(x_ref, y_ref, o_ref):
    # Pure VPU elementwise multiply on one (tr, cols) tile: vld / vmul / vst only.
    o_ref[...] = (x_ref[...] * y_ref[...]).astype(o_ref.dtype)


def _pick_row_tile(rows, cols, itemsize):
    """Largest power-of-two-scaled row tile (multiple of 8) dividing rows within budget."""
    max_tr = max(_SUBLANE, min(rows, _MAX_BLOCK_BYTES // (cols * itemsize)))
    tr = _SUBLANE
    while rows % (tr * 2) == 0 and tr * 2 <= max_tr:
        tr *= 2
    return tr


def _choose_layout(n, itemsize):
    """Return (rows, cols, row_tile, padded_n) for a lane-dense 2-D view of n elems."""
    # 1) Lane-friendly: widest cols (multiple of 128) dividing n with rows on
    #    the 8-sublane grid.
    candidates = [c for c in (2048, 1024, 512, 256, 128) if n % c == 0]
    for cols in candidates:
        rows = n // cols
        if rows % _SUBLANE == 0:
            return rows, cols, _pick_row_tile(rows, cols, itemsize), n
    # 2) Small ragged arrays: one full-array block (block_shape == full dims is
    #    always lowerable).
    if n * itemsize <= _FULL_BLOCK_BYTES:
        if candidates:
            cols = candidates[0]
            return n // cols, cols, n // cols, n
        return 1, n, 1, n
    # 3) Large ragged arrays: pad the flat view to a whole number of
    #    (row_tile x 512) blocks; the tail is sliced off after the kernel.
    cols = 4 * _LANE
    tr = max(_SUBLANE, min(2048, _MAX_BLOCK_BYTES // (cols * itemsize)))
    tr = 1 << (tr.bit_length() - 1)  # round down to a power of two (>= 8)
    block = tr * cols
    padded = ((n + block - 1) // block) * block
    return padded // cols, cols, tr, padded


def my_mul(x: jax.Array, y: jax.Array) -> jax.Array:
    """Elementwise x * y (PyTorch MyMul.forward) via a tiled Pallas TPU kernel."""
    x = jnp.asarray(x)
    y = jnp.asarray(y)
    x, y = jnp.broadcast_arrays(x, y)          # PyTorch broadcasting semantics
    out_dtype = jnp.result_type(x.dtype, y.dtype)
    shape = x.shape
    n = math.prod(shape) if shape else 1
    if n == 0:
        return jnp.zeros(shape, out_dtype)

    itemsize = max(jnp.dtype(x.dtype).itemsize,
                   jnp.dtype(y.dtype).itemsize,
                   jnp.dtype(out_dtype).itemsize)
    rows, cols, tr, padded_n = _choose_layout(n, itemsize)

    xf = x.reshape(-1)
    yf = y.reshape(-1)
    if padded_n != n:
        xf = jnp.pad(xf, (0, padded_n - n))
        yf = jnp.pad(yf, (0, padded_n - n))
    x2d = xf.reshape(rows, cols)
    y2d = yf.reshape(rows, cols)

    bytes_accessed = n * (jnp.dtype(x.dtype).itemsize
                          + jnp.dtype(y.dtype).itemsize
                          + jnp.dtype(out_dtype).itemsize)

    out2d = pl.pallas_call(
        _mul_kernel,
        out_shape=jax.ShapeDtypeStruct((rows, cols), out_dtype),
        grid_spec=pltpu.PrefetchScalarGridSpec(
            num_scalar_prefetch=0,
            grid=(rows // tr,),
            in_specs=[
                pl.BlockSpec((tr, cols), lambda i: (i, 0)),
                pl.BlockSpec((tr, cols), lambda i: (i, 0)),
            ],
            out_specs=pl.BlockSpec((tr, cols), lambda i: (i, 0)),
        ),
        compiler_params=pltpu.CompilerParams(
            # Mem-bound elementwise op: a parallel grid axis lets v7x shard the
            # loop across both TensorCores; neutral on single-core v5e/v6e.
            dimension_semantics=("parallel",),
            vmem_limit_bytes=_VMEM_LIMIT_BYTES,
        ),
        cost_estimate=pl.CostEstimate(
            flops=n, transcendentals=0, bytes_accessed=bytes_accessed),
    )(x2d, y2d)

    out = out2d.reshape(-1)
    if padded_n != n:
        out = out[:n]
    return out.reshape(shape)


if __name__ == "__main__":
    key = jax.random.PRNGKey(0)
    kx, ky, ka, kb = jax.random.split(key, 4)

    # Main test: small 4-D tensors, as implied by the module's generic forward.
    shape = (2, 4, 16, 16)
    x = jax.random.normal(kx, shape, dtype=jnp.float32)
    y = jax.random.normal(ky, shape, dtype=jnp.float32)
    out = jax.block_until_ready(my_mul(x, y))
    ref = x * y
    assert out.shape == ref.shape, out.shape
    assert out.dtype == ref.dtype, out.dtype
    assert bool(jnp.allclose(out, ref, rtol=1e-6, atol=1e-6))

    # Broadcasting path (x * y with y broadcast over leading dims).
    yb = jax.random.normal(kb, (16, 16), dtype=jnp.float32)
    out_b = jax.block_until_ready(my_mul(x, yb))
    assert bool(jnp.allclose(out_b, x * yb, rtol=1e-6, atol=1e-6))

    # Lane-ragged small shape (single full-block path).
    a = jax.random.normal(ka, (3, 5, 7), dtype=jnp.float32)
    b = jax.random.normal(kb, (3, 5, 7), dtype=jnp.float32)
    out_r = jax.block_until_ready(my_mul(a, b))
    assert bool(jnp.allclose(out_r, a * b, rtol=1e-6, atol=1e-6))

    print("KERNEL_OK")
</pallas_src>

<mosaic_0001>
module attributes {stable_mosaic.version = 11 : i64} {
  func.func @_mul_kernel(%arg0: i32, %arg1: memref<8x256xf32, #tpu.memory_space<vmem>>, %arg2: memref<8x256xf32, #tpu.memory_space<vmem>>, %arg3: memref<8x256xf32, #tpu.memory_space<vmem>>) attributes {dimension_semantics = [#tpu.dimension_semantics<parallel>], iteration_bounds = array<i64: 1>, scalar_prefetch = 0 : i64, scratch_operands = 0 : i64, tpu.core_type = #tpu.core_type<tc>, window_params = [{transform_indices = @transform_0, window_bounds = array<i64: 8, 256>}, {transform_indices = @transform_1, window_bounds = array<i64: 8, 256>}, {transform_indices = @transform_2, window_bounds = array<i64: 8, 256>}]} {
    %c0 = arith.constant 0 : index
    %c0_0 = arith.constant 0 : index
    %0 = vector.load %arg1[%c0, %c0_0] : memref<8x256xf32, #tpu.memory_space<vmem>>, vector<8x256xf32>
    %c0_1 = arith.constant 0 : index
    %c0_2 = arith.constant 0 : index
    %1 = vector.load %arg2[%c0_1, %c0_2] : memref<8x256xf32, #tpu.memory_space<vmem>>, vector<8x256xf32>
    %2 = arith.mulf %0, %1 : vector<8x256xf32>
    %c0_3 = arith.constant 0 : index
    %c0_4 = arith.constant 0 : index
    %3 = vector.load %arg3[%c0_3, %c0_4] : memref<8x256xf32, #tpu.memory_space<vmem>>, vector<8x256xf32>
    tpu.vector_store %arg3[%c0_3, %c0_4], %2 {strides = array<i32>} : memref<8x256xf32, #tpu.memory_space<vmem>>, vector<8x256xf32>,
    return
  }
  func.func @transform_0(%arg0: i32) -> (i32, i32) {
    %c0_i32 = arith.constant 0 : i32
    %c0_i32_0 = arith.constant 0 : i32
    return %arg0, %c0_i32 : i32, i32
  }
  func.func @transform_1(%arg0: i32) -> (i32, i32) {
    %c0_i32 = arith.constant 0 : i32
    %c0_i32_0 = arith.constant 0 : i32
    return %arg0, %c0_i32 : i32, i32
  }
  func.func @transform_2(%arg0: i32) -> (i32, i32) {
    %c0_i32 = arith.constant 0 : i32
    %c0_i32_0 = arith.constant 0 : i32
    return %arg0, %c0_i32 : i32, i32
  }
}

</mosaic_0001>

<bundles_post_ra>
// kernel: tpu_custom_call.1
= control target key start
LH: loop header
LB: loop body
LE: loop exit
PB: predicated region body
PF: predicated region fallthrough
CT: control target
= control target key end

     0   :  { %7 = vsyncpa [#allocation3], 0  ;;  %s189_s0 = inlined_call_operand.hbm [shape: f32[8,256], index: 0, kind: input, shape index: {}]   ;;  %s190_s1 = inlined_call_operand.hbm [shape: f32[8,256], index: 1, kind: input, shape index: {}]   ;;  %s191_s2 = inlined_call_operand.hbm [shape: f32[8,256], index: 2, kind: output, shape index: {}]  }
   0x1   :  { %8 = vsyncpa [#allocation6], 0 }
   0x2   :  { %9 = vsyncpa [#allocation4], 0  ;;  %s135_s9 = smov [#allocation2]   ;;  %s136_s11 = smov [#allocation5]  }
   0x3   :  { %s16_s10 = sshll.u32 %s135_s9, 4  ;;  %s26_s12 = sshll.u32 %s136_s11, 4  ;;  %s17_s10 = int_to_ptr.vmem [resolvable:$true] %s16_s10  ;;  %s27_s12 = int_to_ptr.vmem [resolvable:$true] %s26_s12 }
   0x4   :  { %s63_s15 = scalar_lea.hbm %s189_s0, 256 }
   0x5   :  { %p64_p0 = scmp.ne.s32.totalorder %s189_s0, %s63_s15  ;;  %p67_p1 = scmp.lt.u32.totalorder %s63_s15, %s189_s0 }
   0x7   :  { %p69_p2 = pnand %p67_p1, %p64_p0 }
   0x9   :  { %72 = shalt.err (!%p69_p2)
}
   0xa   :  { %s73_s20 = scalar_lea.vmem %s17_s10, 256  ;;  %p78_p4 = scmp.lt.s32.totalorder %s17_s10, %s17_s10 }
   0xb   :  { %p74_p3 = scmp.ne.s32.totalorder %s17_s10, %s73_s20  ;;  %p79_p5 = scmp.lt.s32.totalorder %s73_s20, %s73_s20 }
   0xd   :  { %p80_p6 = por %p79_p5, %p78_p4 }
   0xf   :  { %p81_p7 = pnand %p80_p6, %p74_p3 }
  0x11   :  { %84 = shalt.err (!%p81_p7)
}
  0x12   :  { %19 = dma.hbm_to_vmem [thread:$0]  %s189_s0, 256, %s17_s10, [#allocation3]  }
  0x13   :  { %s85_s25 = scalar_lea.hbm %s190_s1, 256 }
  0x14   :  { %p86_p8 = scmp.ne.s32.totalorder %s190_s1, %s85_s25  ;;  %p89_p9 = scmp.lt.u32.totalorder %s85_s25, %s190_s1 }
  0x16   :  { %p91_p10 = pnand %p89_p9, %p86_p8 }
  0x18   :  { %94 = shalt.err (!%p91_p10)
}
  0x19   :  { %s95_s30 = scalar_lea.vmem %s27_s12, 256  ;;  %p100_p12 = scmp.lt.s32.totalorder %s27_s12, %s27_s12 }
  0x1a   :  { %p96_p11 = scmp.ne.s32.totalorder %s27_s12, %s95_s30  ;;  %p101_p13 = scmp.lt.s32.totalorder %s95_s30, %s95_s30 }
  0x1c   :  { %p102_p0 = por %p101_p13, %p100_p12 }
  0x1e   :  { %p103_p1 = pnand %p102_p0, %p96_p11 }
  0x20   :  { %106 = shalt.err (!%p103_p1)
}
  0x21   :  { %29 = dma.hbm_to_vmem [thread:$0]  %s190_s1, 256, %s27_s12, [#allocation6]  }
  0x22   :  { %129 = dma.done.wait [#allocation3], 256  }
  0x23   :  { %130 = vsyncadd [#allocation3], 4294967040 }
  0x24   :  { %131 = dma.done.wait [#allocation6], 256  }
  0x25   :  { %132 = vsyncadd [#allocation6], 4294967040  ;;  %s137_s4 = smov [#allocation7]   ;;  %v36_v0 = vld [vmem:[#allocation2] sm:$0xff]  ;;  %v38_v1 = vld [vmem:[#allocation5] sm:$0xff] }
  0x26   :  { %s50_s5 = sshll.u32 %s137_s4, 4  ;;  %v37_v2 = vld [vmem:[#allocation2 + $0x8] sm:$0xff]  ;;  %v40_v3 = vmul.f32 %v38_v1, %v36_v0  ;;  %v39_v4 = vld [vmem:[#allocation5 + $0x8] sm:$0xff]  ;;  %s51_s5 = int_to_ptr.vmem [resolvable:$true] %s50_s5 }
  0x27   :  { %v41_v5 = vmul.f32 %v39_v4, %v37_v2  ;;  %s107_s6 = scalar_lea.vmem %s51_s5, 256  ;;  %p112_p3 = scmp.lt.s32.totalorder %s51_s5, %s51_s5 }
  0x28   :  { %42 = vst [vmem:[#allocation7] sm:$0xff] %v40_v3  ;;  %p108_p2 = scmp.ne.s32.totalorder %s51_s5, %s107_s6  ;;  %p113_p4 = scmp.lt.s32.totalorder %s107_s6, %s107_s6 }
  0x29   :  { %43 = vst [vmem:[#allocation7 + $0x8] sm:$0xff] %v41_v5 }
  0x2a   :  { %p114_p5 = por %p113_p4, %p112_p3 }
  0x2c   :  { %p115_p6 = pnand %p114_p5, %p108_p2 }
  0x2e   :  { %118 = shalt.err (!%p115_p6)
}
  0x2f   :  { %s119_s8 = scalar_lea.hbm %s191_s2, 256 }
  0x30   :  { %p120_p7 = scmp.ne.s32.totalorder %s191_s2, %s119_s8  ;;  %p123_p8 = scmp.lt.u32.totalorder %s119_s8, %s191_s2 }
  0x32   :  { %p125_p9 = pnand %p123_p8, %p120_p7 }
  0x34   :  { %128 = shalt.err (!%p125_p9)
}
  0x35   :  { %53 = dma.vmem_to_hbm [thread:$0]  %s51_s5, 256, %s191_s2, [#allocation4]  }
  0x36   :  { %133 = dma.done.wait [#allocation4], 256  }
  0x37   :  { %134 = vsyncadd [#allocation4], 4294967040 }
  0x38   :  { %57 = vsyncpa [#allocation3], 1 }
  0x39   :  { %58 = vsyncpa [#allocation6], 1 }
  0x3a   :  { %59 = vsyncpa [#allocation4], 1 }

</bundles_post_ra>
